<compile_context>
chip_gen: v7x
topology: tpu7x:2x2x1
jax: 0.10.0
libtpu: 0.0.40
codegen_flags: <defaults>
</compile_context>

<pallas_src>
import functools

import jax
import jax.numpy as jnp
from jax.experimental import pallas as pl
from jax.experimental.pallas import tpu as pltpu

BN_EPS = 1e-5  # PyTorch BatchNorm1d default eps


def _round_up(n, m):
    return ((n + m - 1) // m) * m


def fusion_kernel(x_ref, w1_ref, bias_ref, w2_ref, o_ref, *, h_pad, num_classes):
    # Packed bias slab: row 0 = folded fc1+BN bias (padded to h_pad),
    #                   row 1 = fc2 bias (first num_classes lanes valid).
    b1 = bias_ref[0:1, :h_pad]           # (1, H_pad) — unmasked, lane-dense
    b2 = bias_ref[1:2, :num_classes]     # (1, C)     — tiny, static slice

    # In-kernel cast of the x tile to the compute dtype (bf16 fast path):
    # x stays f32 in HBM, the cast rides a free VPU slot.
    xv = x_ref[...].astype(w1_ref.dtype)

    # fc1 with BatchNorm folded into (w1_eff, b1_eff); ReLU.
    h = jnp.dot(xv, w1_ref[...], preferred_element_type=jnp.float32) + b1
    h = jnp.maximum(h, 0.0)

    # Dropout(p=0.1) in eval mode is identity.
    # TODO(synk): training-mode BatchNorm (batch stats) / Dropout masking not implemented.

    # fc2: (tm, H_pad) @ (H_pad, C) -> (tm, C); padded H rows of w2 are zero.
    out = jnp.dot(h.astype(w2_ref.dtype), w2_ref[...],
                  preferred_element_type=jnp.float32) + b2
    o_ref[...] = out.astype(o_ref.dtype)


def fold_fusion_params(w1, b1, gamma, beta, running_mean, running_var, w2, b2,
                       *, use_bf16=True):
    """One-time parameter transform (do offline, not per forward call).

    Folds eval-mode BatchNorm1d into fc1, zero-pads the hidden dim to a
    multiple of 128 (lane-dense matmuls), and packs both biases into one
    lane-padded slab. Optionally casts weights to bf16 for the MXU fast path.
    """
    D, H = w1.shape
    C = w2.shape[1]
    h_pad = _round_up(H, 128)
    slab_w = max(h_pad, _round_up(C, 128))

    scale = gamma * jax.lax.rsqrt(running_var + BN_EPS)          # (1, H)
    w1_fold = w1 * scale                                         # (D, H)
    b1_fold = (b1 - running_mean) * scale + beta                 # (1, H)

    w1_eff = jnp.zeros((D, h_pad), jnp.float32).at[:, :H].set(w1_fold)
    w2_eff = jnp.zeros((h_pad, C), jnp.float32).at[:H, :].set(w2)

    bias = jnp.zeros((2, slab_w), jnp.float32)
    bias = bias.at[0, :H].set(b1_fold.reshape(-1))
    bias = bias.at[1, :C].set(b2.reshape(-1))

    if use_bf16:  # bf16 MXU operands, f32 accumulation
        w1_eff = w1_eff.astype(jnp.bfloat16)
        w2_eff = w2_eff.astype(jnp.bfloat16)

    return w1_eff, bias, w2_eff, C


def fusion_layer_apply(x, w1_eff, bias, w2_eff, num_classes, *, block_m=1024):
    """Per-call forward using pre-folded parameters."""
    B, D = x.shape
    h_pad = w1_eff.shape[1]
    C = num_classes

    # Batch tiling: largest tile up to block_m, but aim for >=2 grid steps when
    # B allows so v7x's 2 TensorCores both get work. x stays f32 in HBM, so
    # 8-row sublane alignment is sufficient.
    tm = min(block_m, _round_up(max(pl.cdiv(B, 2), 1), 8))
    tm = min(tm, _round_up(B, 8))
    mt = pl.cdiv(B, tm)

    # Explicit VMEM budget (v5e default scoped limit is only 16 MiB; v7x has
    # 64 MiB physical). Weights are single-buffered, x/out double-buffered.
    w_item = jnp.dtype(w1_eff.dtype).itemsize
    vmem_est = (2 * tm * D * 4            # x tiles (double-buffered, f32)
                + 2 * tm * C * 4          # out tiles (double-buffered, f32)
                + D * h_pad * w_item      # w1_eff (single-buffered)
                + bias.size * 4           # bias slab
                + h_pad * C * w_item)     # w2_eff
    vmem_limit = int(min(max(2 * vmem_est + (4 << 20), 32 << 20), 64 << 20))

    kernel = functools.partial(fusion_kernel, h_pad=h_pad, num_classes=C)

    out = pl.pallas_call(
        kernel,
        out_shape=jax.ShapeDtypeStruct((B, C), jnp.float32),
        grid=(mt,),
        in_specs=[
            # x: tiled over batch rows (ragged last block handled by Pallas).
            pl.BlockSpec((tm, D), lambda i: (i, 0)),
            # Weights / biases: constant index_map => VMEM-resident; single
            # buffer (they never change block) to save VMEM on v7x.
            pl.BlockSpec((D, h_pad), lambda i: (0, 0),
                         pipeline_mode=pl.Buffered(1)),
            pl.BlockSpec(bias.shape, lambda i: (0, 0),
                         pipeline_mode=pl.Buffered(1)),
            pl.BlockSpec((h_pad, C), lambda i: (0, 0),
                         pipeline_mode=pl.Buffered(1)),
        ],
        out_specs=pl.BlockSpec((tm, C), lambda i: (i, 0)),
        compiler_params=pltpu.CompilerParams(
            dimension_semantics=("parallel",),
            vmem_limit_bytes=vmem_limit),
    )(x, w1_eff, bias, w2_eff)

    return out


def fusion_layer(x, w1, b1, gamma, beta, running_mean, running_var, w2, b2,
                 *, use_bf16=True, block_m=1024):
    """Convenience wrapper: fold params then run the kernel."""
    w1_eff, bias, w2_eff, C = fold_fusion_params(
        w1, b1, gamma, beta, running_mean, running_var, w2, b2,
        use_bf16=use_bf16)
    return fusion_layer_apply(x, w1_eff, bias, w2_eff, C, block_m=block_m)


def reference(x, w1, b1, gamma, beta, running_mean, running_var, w2, b2):
    h = x @ w1 + b1
    h = (h - running_mean) / jnp.sqrt(running_var + BN_EPS) * gamma + beta
    h = jnp.maximum(h, 0.0)
    return h @ w2 + b2


if __name__ == "__main__":
    B, input_dim, hidden, num_classes = 8, 32, 64, 8

    key = jax.random.PRNGKey(0)
    kx, kw1, kb1, kw2, kb2, kg, kbe, km, kv, kx2 = jax.random.split(key, 10)

    x = jax.random.normal(kx, (B, input_dim), dtype=jnp.float32)

    # fc1: PyTorch weight (64, input_dim) stored transposed -> (input_dim, 64)
    w1 = jax.random.normal(kw1, (input_dim, hidden), dtype=jnp.float32) * 0.1
    b1 = jax.random.normal(kb1, (1, hidden), dtype=jnp.float32) * 0.1
    # BatchNorm1d(64) params + running stats (eval mode)
    gamma = 1.0 + 0.1 * jax.random.normal(kg, (1, hidden), dtype=jnp.float32)
    beta = 0.1 * jax.random.normal(kbe, (1, hidden), dtype=jnp.float32)
    running_mean = 0.1 * jax.random.normal(km, (1, hidden), dtype=jnp.float32)
    running_var = jnp.abs(1.0 + 0.1 * jax.random.normal(kv, (1, hidden), dtype=jnp.float32))
    # fc2: PyTorch weight (num_classes, 64) stored transposed -> (64, num_classes)
    w2 = jax.random.normal(kw2, (hidden, num_classes), dtype=jnp.float32) * 0.1
    b2 = jax.random.normal(kb2, (1, num_classes), dtype=jnp.float32) * 0.1

    ref = reference(x, w1, b1, gamma, beta, running_mean, running_var, w2, b2)

    # 1) f32 path — strict validation.
    out_f32 = fusion_layer(x, w1, b1, gamma, beta, running_mean, running_var,
                           w2, b2, use_bf16=False)
    out_f32 = jax.block_until_ready(out_f32)
    assert out_f32.shape == (B, num_classes)
    assert jnp.allclose(out_f32, ref, atol=1e-5, rtol=1e-5), "f32 mismatch vs reference"

    # 2) bf16 MXU-operand fast path — relaxed tolerance (bf16 rounding of weights).
    out_bf16 = fusion_layer(x, w1, b1, gamma, beta, running_mean, running_var,
                            w2, b2, use_bf16=True)
    out_bf16 = jax.block_until_ready(out_bf16)
    assert out_bf16.shape == (B, num_classes)
    assert jnp.allclose(out_bf16, ref, atol=5e-2, rtol=5e-2), "bf16 mismatch vs reference"

    # 3) Ragged-batch case (B not a multiple of the tile) — exercises the
    #    masked last output block with no wrapper-side padding.
    B2 = 20
    x2 = jax.random.normal(kx2, (B2, input_dim), dtype=jnp.float32)
    ref2 = reference(x2, w1, b1, gamma, beta, running_mean, running_var, w2, b2)
    out2 = fusion_layer(x2, w1, b1, gamma, beta, running_mean, running_var,
                        w2, b2, use_bf16=False)
    out2 = jax.block_until_ready(out2)
    assert out2.shape == (B2, num_classes)
    assert jnp.allclose(out2, ref2, atol=1e-5, rtol=1e-5), "ragged-B mismatch vs reference"

    print("KERNEL_OK")
</pallas_src>

<mosaic_0001>
module attributes {stable_mosaic.version = 11 : i64} {
  func.func @fusion_kernel(%arg0: i32, %arg1: memref<8x32xf32, #tpu.memory_space<vmem>>, %arg2: memref<32x128xf32, #tpu.memory_space<vmem>>, %arg3: memref<2x128xf32, #tpu.memory_space<vmem>>, %arg4: memref<128x8xf32, #tpu.memory_space<vmem>>, %arg5: memref<8x8xf32, #tpu.memory_space<vmem>>) attributes {dimension_semantics = [#tpu.dimension_semantics<parallel>], iteration_bounds = array<i64: 1>, scalar_prefetch = 0 : i64, scratch_operands = 0 : i64, tpu.core_type = #tpu.core_type<tc>, window_params = [{transform_indices = @transform_0, window_bounds = array<i64: 8, 32>}, {pipeline_mode = #tpu.pipeline_mode<synchronous>, transform_indices = @transform_1, window_bounds = array<i64: 32, 128>}, {pipeline_mode = #tpu.pipeline_mode<synchronous>, transform_indices = @transform_2, window_bounds = array<i64: 2, 128>}, {pipeline_mode = #tpu.pipeline_mode<synchronous>, transform_indices = @transform_3, window_bounds = array<i64: 128, 8>}, {transform_indices = @transform_4, window_bounds = array<i64: 8, 8>}]} {
    %c0 = arith.constant 0 : index
    %c0_0 = arith.constant 0 : index
    %0 = vector.load %arg3[%c0, %c0_0] : memref<2x128xf32, #tpu.memory_space<vmem>>, vector<1x128xf32>
    %c1 = arith.constant 1 : index
    %c0_1 = arith.constant 0 : index
    %1 = vector.load %arg3[%c1, %c0_1] : memref<2x128xf32, #tpu.memory_space<vmem>>, vector<1x8xf32>
    %c0_2 = arith.constant 0 : index
    %c0_3 = arith.constant 0 : index
    %2 = vector.load %arg1[%c0_2, %c0_3] : memref<8x32xf32, #tpu.memory_space<vmem>>, vector<8x32xf32>
    %c0_4 = arith.constant 0 : index
    %c0_5 = arith.constant 0 : index
    %3 = vector.load %arg2[%c0_4, %c0_5] : memref<32x128xf32, #tpu.memory_space<vmem>>, vector<32x128xf32>
    %cst = arith.constant dense<0.000000e+00> : vector<8x128xf32>
    %4 = tpu.matmul %2, %3, %cst {dimension_numbers = #tpu.dot_dimension_numbers<[1], [0], [0], [1], [0, 0, 1, 1], [], []>} : vector<8x32xf32>, vector<32x128xf32>, vector<8x128xf32> -> vector<8x128xf32>
    %5 = vector.broadcast %0 : vector<1x128xf32> to vector<8x128xf32>
    %6 = arith.addf %4, %5 : vector<8x128xf32>
    %cst_6 = arith.constant 0.000000e+00 : f32
    %7 = vector.broadcast %cst_6 : f32 to vector<8x128xf32>
    %8 = arith.maximumf %6, %7 : vector<8x128xf32>
    %c0_7 = arith.constant 0 : index
    %c0_8 = arith.constant 0 : index
    %9 = vector.load %arg4[%c0_7, %c0_8] : memref<128x8xf32, #tpu.memory_space<vmem>>, vector<128x8xf32>
    %cst_9 = arith.constant dense<0.000000e+00> : vector<8x8xf32>
    %10 = tpu.matmul %8, %9, %cst_9 {dimension_numbers = #tpu.dot_dimension_numbers<[1], [0], [0], [1], [0, 0, 1, 1], [], []>} : vector<8x128xf32>, vector<128x8xf32>, vector<8x8xf32> -> vector<8x8xf32>
    %11 = vector.broadcast %1 : vector<1x8xf32> to vector<8x8xf32>
    %12 = arith.addf %10, %11 : vector<8x8xf32>
    %c0_10 = arith.constant 0 : index
    %c0_11 = arith.constant 0 : index
    %13 = vector.load %arg5[%c0_10, %c0_11] : memref<8x8xf32, #tpu.memory_space<vmem>>, vector<8x8xf32>
    tpu.vector_store %arg5[%c0_10, %c0_11], %12 {strides = array<i32>} : memref<8x8xf32, #tpu.memory_space<vmem>>, vector<8x8xf32>,
    return
  }
  func.func @transform_0(%arg0: i32) -> (i32, i32) {
    %c0_i32 = arith.constant 0 : i32
    %c0_i32_0 = arith.constant 0 : i32
    return %arg0, %c0_i32 : i32, i32
  }
  func.func @transform_1(%arg0: i32) -> (i32, i32) {
    %c0_i32 = arith.constant 0 : i32
    %c0_i32_0 = arith.constant 0 : i32
    %c0_i32_1 = arith.constant 0 : i32
    return %c0_i32, %c0_i32_0 : i32, i32
  }
  func.func @transform_2(%arg0: i32) -> (i32, i32) {
    %c0_i32 = arith.constant 0 : i32
    %c0_i32_0 = arith.constant 0 : i32
    %c0_i32_1 = arith.constant 0 : i32
    return %c0_i32, %c0_i32_0 : i32, i32
  }
  func.func @transform_3(%arg0: i32) -> (i32, i32) {
    %c0_i32 = arith.constant 0 : i32
    %c0_i32_0 = arith.constant 0 : i32
    %c0_i32_1 = arith.constant 0 : i32
    return %c0_i32, %c0_i32_0 : i32, i32
  }
  func.func @transform_4(%arg0: i32) -> (i32, i32) {
    %c0_i32 = arith.constant 0 : i32
    %c0_i32_0 = arith.constant 0 : i32
    return %arg0, %c0_i32 : i32, i32
  }
}

</mosaic_0001>

<bundles_post_ra>
// kernel: tpu_custom_call.1
= control target key start
LH: loop header
LB: loop body
LE: loop exit
PB: predicated region body
PF: predicated region fallthrough
CT: control target
= control target key end

     0   :  { %v339_v3 = vmov 0.0|0.0   ;;  %vm340_vm0 = vmmov 0   ;;  %v341_v6 = vmov 0.0   ;;  %s449_s0 = inlined_call_operand.vmem [shape: f32[8,32], index: 0, kind: input, shape index: {}]   ;;  %s450_s1 = inlined_call_operand.vmem [shape: f32[32,128], index: 1, kind: input, shape index: {}]   ;;  %s451_s2 = inlined_call_operand.vmem [shape: f32[2,128], index: 2, kind: input, shape index: {}]   ;;  %s452_s3 = inlined_call_operand.vmem [shape: f32[128,8], index: 3, kind: input, shape index: {}]   ;;  %s453_s4 = inlined_call_operand.hbm [shape: f32[8,8], index: 4, kind: output, shape index: {}]  }
   0x1   :  { %v21_v0 = vld [vmem:[%s450_s1] sm:$0xff]  ;;  %v22_v1 = vld [vmem:[%s450_s1 + $0x8] sm:$0xff]  ;;  %v23_v2 = vld [vmem:[%s450_s1 + $0x10] sm:$0xff]  ;;  %281 = vmatprep.subr.bf16.mxu0 %v339_v3  ;;  %243 = vmatprep.mubr.msk.f32.mxu0 %vm340_vm0, %v341_v6 }
   0x2   :  { %v282_v4 = vpack.c.bf16 %v22_v1, %v21_v0  ;;  %v24_v5 = vld [vmem:[%s450_s1 + $0x18] sm:$0xff]  ;;  %v104_v7 = vld [vmem:[%s452_s3] sm:$0xff]  ;;  %287 = vmatprep.subr.bf16.mxu1 %v339_v3  ;;  %v105_v8 = vld [vmem:[%s452_s3 + $0x8] sm:$0xff]  ;;  %278 = vmatprep.mubr.msk.f32.mxu1 %vm340_vm0, %v341_v6 }
   0x3   :  { %v106_v9 = vld [vmem:[%s452_s3 + $0x10] sm:$0xff]  ;;  %v107_v10 = vld [vmem:[%s452_s3 + $0x18] sm:$0xff]  ;;  %v285_v11 = vpack.c.bf16 %v24_v5, %v23_v2  ;;  %v288_v12 = vpack.c.bf16 %v105_v8, %v104_v7  ;;  %v108_v14 = vld [vmem:[%s452_s3 + $0x20] sm:$0xff] }
   0x4   :  { %283 = vmatpush3.bf16.msra.mxu0 %v282_v4  ;;  %v291_v13 = vpack.c.bf16 %v107_v10, %v106_v9  ;;  %v109_v15 = vld [vmem:[%s452_s3 + $0x28] sm:$0xff] }
   0x5   :  { %284 = vmatprep.subr.bf16.mxu0 %v339_v3  ;;  %289 = vmatpush3.bf16.msra.mxu1 %v288_v12 }
   0x6   :  { %290 = vmatprep.subr.bf16.mxu1 %v339_v3 }
   0x7   :  { %9 = vsyncpa [#allocation3], 0  ;;  %v20_v16 = vld [vmem:[%s449_s0] sm:$0xff]  ;;  %vm29_vm1 = vcmask 261120   ;;  %v294_v17 = vpack.c.bf16 %v109_v15, %v108_v14  ;;  %v110_v18 = vld [vmem:[%s452_s3 + $0x30] sm:$0xff]  ;;  %s342_s6 = smov [#allocation2]  }
   0x8   :  { %286 = vmatpush3.bf16.msra.mxu0 %v285_v11  ;;  %v111_v19 = vld [vmem:[%s452_s3 + $0x38] sm:$0xff]  ;;  %v112_v21 = vld [vmem:[%s452_s3 + $0x40] sm:$0xff]  ;;  %v113_v22 = vld [vmem:[%s452_s3 + $0x48] sm:$0xff]  ;;  %s202_s7 = sshll.u32 %s342_s6, 4  ;;  %vm194_vm2 = vcmask 64512   ;;  %s203_s7 = int_to_ptr.vmem [resolvable:$true] %s202_s7 }
   0x9   :  { %292 = vmatpush3.bf16.msra.mxu1 %v291_v13  ;;  %v297_v20 = vpack.c.bf16 %v111_v19, %v110_v18  ;;  %v300_v23 = vpack.c.bf16 %v113_v22, %v112_v21  ;;  %v114_v24 = vld [vmem:[%s452_s3 + $0x50] sm:$0xff]  ;;  %v115_v25 = vld [vmem:[%s452_s3 + $0x58] sm:$0xff]  ;;  %v116_v27 = vld [vmem:[%s452_s3 + $0x60] sm:$0xff]  ;;  %p320_p1 = scmp.lt.s32.totalorder %s203_s7, %s203_s7 }
   0xa   :  { %293 = vmatprep.subr.bf16.mxu1 %v339_v3  ;;  %v303_v26 = vpack.c.bf16 %v115_v25, %v114_v24  ;;  %v117_v28 = vld [vmem:[%s452_s3 + $0x68] sm:$0xff]  ;;  %v118_v30 = vld [vmem:[%s452_s3 + $0x70] sm:$0xff]  ;;  %v119_v31 = vld [vmem:[%s452_s3 + $0x78] sm:$0xff]  ;;  %s315_s3 = scalar_lea.vmem %s203_s7, 128 }
   0xb   :  { %244 = vmatmul.mubr.msk.f32.vlgmr.msra.gmra.mrb[0].mxu0 %vm29_vm1, %v20_v16  ;;  %v306_v29 = vpack.c.bf16 %v117_v28, %v116_v27  ;;  %v309_v32 = vpack.c.bf16 %v119_v31, %v118_v30  ;;  %v210_v33 = vld [vmem:[%s451_s2] ss:$0 sm:$0xff]  ;;  %v212_v38 = vld [vmem:[%s451_s2 + $0x1] ss:$0 sm:$0xff]  ;;  %p316_p0 = scmp.ne.s32.totalorder %s203_s7, %s315_s3  ;;  %p321_p2 = scmp.lt.s32.totalorder %s315_s3, %s315_s3 }
   0xd   :  { %295 = vmatpush3.bf16.msra.mxu1 %v294_v17  ;;  %p322_p3 = por %p321_p2, %p320_p1 }
   0xe   :  { %296 = vmatprep.subr.bf16.mxu1 %v339_v3 }
   0xf   :  { %p323_p4 = pnand %p322_p3, %p316_p0 }
  0x11   :  { %298 = vmatpush3.bf16.msra.mxu1 %v297_v20 }
  0x12   :  { %299 = vmatprep.subr.bf16.mxu1 %v339_v3 }
  0x15   :  { %301 = vmatpush3.bf16.msra.mxu1 %v300_v23 }
  0x16   :  { %302 = vmatprep.subr.bf16.mxu1 %v339_v3 }
  0x19   :  { %304 = vmatpush3.bf16.msra.mxu1 %v303_v26 }
  0x1a   :  { %305 = vmatprep.subr.bf16.mxu1 %v339_v3 }
  0x1d   :  { %307 = vmatpush3.bf16.msra.mxu1 %v306_v29 }
  0x1e   :  { %308 = vmatprep.subr.bf16.mxu1 %v339_v3 }
  0x21   :  { %310 = vmatpush3.bf16.msra.mxu1 %v309_v32 }
  0xde   :  { %v99_v34 = vpop.f32.mrb[0].mxu0 }
  0xdf   :  { %v100_v35 = vadd.f32 %v210_v33, %v99_v34  ;;  %v245_v36 = vpop.f32.mrb[1].mxu0 }
  0xe1   :  { %v103_v37 = vmax.f32 %v100_v35, 0.0 }
  0xe3   :  { %279 = vmatmul.mubr.f32.vlgmr.msra.gmra.mrb[0].mxu1 %v103_v37 }
 0x1b6   :  { %v190_v39 = vpop.f32.mrb[0].mxu1 }
 0x1b7   :  { %v191_v40 = vadd.f32 %v212_v38, %v190_v39  ;;  %v280_v41 = vpop.f32.mrb[1].mxu1 }
 0x1b9   :  { %195 = vst.msk [vmem:[#allocation2] sm:$0xff] %vm194_vm2, %v191_v40 }
 0x1ba   :  { %326 = shalt.err (!%p323_p4)
}
 0x1bb   :  { %s327_s10 = scalar_lea.hbm %s453_s4, 128 }
 0x1bc   :  { %p328_p5 = scmp.ne.s32.totalorder %s453_s4, %s327_s10  ;;  %p331_p6 = scmp.lt.u32.totalorder %s327_s10, %s453_s4 }
 0x1be   :  { %p333_p7 = pnand %p331_p6, %p328_p5 }
 0x1c0   :  { %336 = shalt.err (!%p333_p7)
}
 0x1c1   :  { %205 = dma.vmem_to_hbm [thread:$0]  %s203_s7, 128, %s453_s4, [#allocation3]  }
 0x1c2   :  { %337 = dma.done.wait [#allocation3], 128  }
 0x1c3   :  { %338 = vsyncadd [#allocation3], 4294967168 }
 0x1c4   :  { %209 = vsyncpa [#allocation3], 1 }

</bundles_post_ra>
